<compile_context>
chip_gen: v6e
topology: v6e:2x2x1
jax: 0.10.0
libtpu: 0.0.40
codegen_flags: <defaults>
</compile_context>

<pallas_src>
import functools

import jax
import jax.numpy as jnp
from jax.experimental import pallas as pl
from jax.experimental.pallas import tpu as pltpu


def _round_up(n: int, m: int) -> int:
    return (n + m - 1) // m * m


def _fused_mlp_kernel(*refs, num_layers: int):
    # refs = (x_ref, w0, b0, w1, b1, ..., w_{L-1}, b_{L-1}, o_ref)
    x_ref = refs[0]
    o_ref = refs[-1]
    wb = refs[1:-1]

    # Activation lives as a value (vregs / compiler-managed), not a scratch ref.
    h = x_ref[...].astype(jnp.float32)
    for l in range(num_layers):  # static Python loop, unrolled at trace time
        w_ref = wb[2 * l]
        b_ref = wb[2 * l + 1]
        h = jnp.dot(h, w_ref[...], preferred_element_type=jnp.float32)
        h = h + b_ref[...]                      # (1, N_pad) broadcasts over (tm, N_pad)
        if l < num_layers - 1:
            h = jnp.maximum(h, 0.0)             # hidden layers: ReLU epilogue
    o_ref[...] = h.astype(o_ref.dtype)          # final layer: no ReLU


def mlp_forward(params, x, *, block_m: int = 128):
    """Fused MLP forward. params: list of (w (in, out), b (out,)). x: (B, in)."""
    B, in_dim = x.shape
    dims = [in_dim] + [w.shape[1] for w, _ in params]
    L = len(params)
    out_dim = dims[-1]

    # Per-layer lane-dense padded widths (multiples of 128).
    dims_pad = [_round_up(d, 128) for d in dims]
    in_pad, out_pad = dims_pad[0], dims_pad[-1]

    # Batch tiling: tm rows per grid step, multiple of 8 (sublane).
    tm = min(_round_up(block_m, 8), _round_up(B, 8))
    B_pad = _round_up(_round_up(B, 8), tm)

    # Zero-pad input; zero-pad each weight/bias independently to its own shape.
    x_p = jnp.zeros((B_pad, in_pad), x.dtype).at[:B, :in_dim].set(x)
    wb_padded = []
    for l, (w, b) in enumerate(params):
        kp, np_ = dims_pad[l], dims_pad[l + 1]
        w_p = jnp.zeros((kp, np_), jnp.float32).at[: w.shape[0], : w.shape[1]].set(w)
        b_p = jnp.zeros((1, np_), jnp.float32).at[0, : b.shape[0]].set(b)
        wb_padded += [w_p, b_p]

    # VMEM budget: double-buffered activation in/out tiles + all weights/biases
    # (double-buffered allocation, DMA'd once), plus headroom for spilled h.
    act_bytes = 2 * 2 * tm * max(in_pad, out_pad) * 4
    wgt_bytes = 2 * sum(
        (dims_pad[l] * dims_pad[l + 1] + dims_pad[l + 1]) * 4 for l in range(L)
    )
    spill_bytes = tm * max(dims_pad) * 4
    vmem_bytes = act_bytes + wgt_bytes + spill_bytes
    vmem_limit = 32 * 1024 * 1024  # safe on v5e/v6e (128 MiB) and v7x (64 MiB)
    # TODO(synk): if the resident weights ever exceed this budget (very wide
    # layers), fall back to a per-layer (M, N, K)-tiled matmul grid instead of
    # the fully-fused path.
    assert vmem_bytes < vmem_limit, "fused MLP weights do not fit the VMEM budget"

    in_specs = [pl.BlockSpec((tm, in_pad), lambda i: (i, 0))]  # activation tile
    for l in range(L):
        kp, np_ = dims_pad[l], dims_pad[l + 1]
        in_specs.append(pl.BlockSpec((kp, np_), lambda i: (0, 0)))  # weight (resident)
        in_specs.append(pl.BlockSpec((1, np_), lambda i: (0, 0)))   # bias (resident)

    kernel = functools.partial(_fused_mlp_kernel, num_layers=L)
    out_p = pl.pallas_call(
        kernel,
        out_shape=jax.ShapeDtypeStruct((B_pad, out_pad), x.dtype),
        grid_spec=pltpu.PrefetchScalarGridSpec(
            num_scalar_prefetch=0,
            grid=(B_pad // tm,),
            in_specs=in_specs,
            out_specs=pl.BlockSpec((tm, out_pad), lambda i: (i, 0)),
        ),
        compiler_params=pltpu.CompilerParams(
            dimension_semantics=("parallel",),  # shards batch tiles across v7x's 2 TCs
            vmem_limit_bytes=vmem_limit,
        ),
    )(x_p, *wb_padded)

    return out_p[:B, :out_dim]


def init_mlp_params(key, input_size, hidden_size, num_hidden_layers, output_size):
    """Deterministic init mirroring nn.Linear's U(-1/sqrt(fan_in), 1/sqrt(fan_in))."""
    sizes = [input_size] + [hidden_size] * (num_hidden_layers + 1) + [output_size]
    params = []
    for i in range(len(sizes) - 1):
        fan_in, fan_out = sizes[i], sizes[i + 1]
        key, kw, kb = jax.random.split(key, 3)
        bound = 1.0 / jnp.sqrt(float(fan_in))
        # Stored directly in (in, out) layout (== PyTorch weight transposed).
        w = jax.random.uniform(kw, (fan_in, fan_out), jnp.float32, -bound, bound)
        b = jax.random.uniform(kb, (fan_out,), jnp.float32, -bound, bound)
        params.append((w, b))
    return params


if __name__ == "__main__":
    key = jax.random.PRNGKey(0)

    input_size = 16
    hidden_size = 32
    num_hidden_layers = 2
    output_size = 8
    batch = 16

    kp, kx = jax.random.split(key)
    params = init_mlp_params(kp, input_size, hidden_size, num_hidden_layers, output_size)
    x = jax.random.normal(kx, (batch, input_size), jnp.float32)

    # block_m=8 -> grid of 2 batch tiles, exercising the tiled/parallel path.
    out = mlp_forward(params, x, block_m=8)
    jax.block_until_ready(out)

    # Pure-JAX reference of the same forward pass.
    ref = x
    for i, (w, b) in enumerate(params):
        ref = ref @ w + b
        if i < len(params) - 1:
            ref = jnp.maximum(ref, 0.0)
    assert out.shape == (batch, output_size)
    assert jnp.allclose(out, ref, atol=1e-5, rtol=1e-5)

    print("KERNEL_OK")
</pallas_src>

<mosaic_0001>
module attributes {stable_mosaic.version = 11 : i64} {
  func.func @_fused_mlp_kernel(%arg0: i32, %arg1: memref<8x128xf32, #tpu.memory_space<vmem>>, %arg2: memref<128x128xf32, #tpu.memory_space<vmem>>, %arg3: memref<1x128xf32, #tpu.memory_space<vmem>>, %arg4: memref<128x128xf32, #tpu.memory_space<vmem>>, %arg5: memref<1x128xf32, #tpu.memory_space<vmem>>, %arg6: memref<128x128xf32, #tpu.memory_space<vmem>>, %arg7: memref<1x128xf32, #tpu.memory_space<vmem>>, %arg8: memref<128x128xf32, #tpu.memory_space<vmem>>, %arg9: memref<1x128xf32, #tpu.memory_space<vmem>>, %arg10: memref<8x128xf32, #tpu.memory_space<vmem>>) attributes {dimension_semantics = [#tpu.dimension_semantics<parallel>], iteration_bounds = array<i64: 2>, scalar_prefetch = 0 : i64, scratch_operands = 0 : i64, tpu.core_type = #tpu.core_type<tc>, window_params = [{transform_indices = @transform_0, window_bounds = array<i64: 8, 128>}, {pipeline_mode = #tpu.pipeline_mode<synchronous>, transform_indices = @transform_1, window_bounds = array<i64: 128, 128>}, {pipeline_mode = #tpu.pipeline_mode<synchronous>, transform_indices = @transform_2, window_bounds = array<i64: 1, 128>}, {pipeline_mode = #tpu.pipeline_mode<synchronous>, transform_indices = @transform_3, window_bounds = array<i64: 128, 128>}, {pipeline_mode = #tpu.pipeline_mode<synchronous>, transform_indices = @transform_4, window_bounds = array<i64: 1, 128>}, {pipeline_mode = #tpu.pipeline_mode<synchronous>, transform_indices = @transform_5, window_bounds = array<i64: 128, 128>}, {pipeline_mode = #tpu.pipeline_mode<synchronous>, transform_indices = @transform_6, window_bounds = array<i64: 1, 128>}, {pipeline_mode = #tpu.pipeline_mode<synchronous>, transform_indices = @transform_7, window_bounds = array<i64: 128, 128>}, {pipeline_mode = #tpu.pipeline_mode<synchronous>, transform_indices = @transform_8, window_bounds = array<i64: 1, 128>}, {transform_indices = @transform_9, window_bounds = array<i64: 8, 128>}]} {
    %c0 = arith.constant 0 : index
    %c0_0 = arith.constant 0 : index
    %0 = vector.load %arg1[%c0, %c0_0] : memref<8x128xf32, #tpu.memory_space<vmem>>, vector<8x128xf32>
    %c0_1 = arith.constant 0 : index
    %c0_2 = arith.constant 0 : index
    %1 = vector.load %arg2[%c0_1, %c0_2] : memref<128x128xf32, #tpu.memory_space<vmem>>, vector<128x128xf32>
    %cst = arith.constant dense<0.000000e+00> : vector<8x128xf32>
    %2 = tpu.matmul %0, %1, %cst {dimension_numbers = #tpu.dot_dimension_numbers<[1], [0], [0], [1], [0, 0, 1, 1], [], []>} : vector<8x128xf32>, vector<128x128xf32>, vector<8x128xf32> -> vector<8x128xf32>
    %c0_3 = arith.constant 0 : index
    %c0_4 = arith.constant 0 : index
    %3 = vector.load %arg3[%c0_3, %c0_4] : memref<1x128xf32, #tpu.memory_space<vmem>>, vector<1x128xf32>
    %4 = vector.broadcast %3 : vector<1x128xf32> to vector<8x128xf32>
    %5 = arith.addf %2, %4 : vector<8x128xf32>
    %cst_5 = arith.constant 0.000000e+00 : f32
    %6 = vector.broadcast %cst_5 : f32 to vector<8x128xf32>
    %7 = arith.maximumf %5, %6 : vector<8x128xf32>
    %c0_6 = arith.constant 0 : index
    %c0_7 = arith.constant 0 : index
    %8 = vector.load %arg4[%c0_6, %c0_7] : memref<128x128xf32, #tpu.memory_space<vmem>>, vector<128x128xf32>
    %cst_8 = arith.constant dense<0.000000e+00> : vector<8x128xf32>
    %9 = tpu.matmul %7, %8, %cst_8 {dimension_numbers = #tpu.dot_dimension_numbers<[1], [0], [0], [1], [0, 0, 1, 1], [], []>} : vector<8x128xf32>, vector<128x128xf32>, vector<8x128xf32> -> vector<8x128xf32>
    %c0_9 = arith.constant 0 : index
    %c0_10 = arith.constant 0 : index
    %10 = vector.load %arg5[%c0_9, %c0_10] : memref<1x128xf32, #tpu.memory_space<vmem>>, vector<1x128xf32>
    %11 = vector.broadcast %10 : vector<1x128xf32> to vector<8x128xf32>
    %12 = arith.addf %9, %11 : vector<8x128xf32>
    %cst_11 = arith.constant 0.000000e+00 : f32
    %13 = vector.broadcast %cst_11 : f32 to vector<8x128xf32>
    %14 = arith.maximumf %12, %13 : vector<8x128xf32>
    %c0_12 = arith.constant 0 : index
    %c0_13 = arith.constant 0 : index
    %15 = vector.load %arg6[%c0_12, %c0_13] : memref<128x128xf32, #tpu.memory_space<vmem>>, vector<128x128xf32>
    %cst_14 = arith.constant dense<0.000000e+00> : vector<8x128xf32>
    %16 = tpu.matmul %14, %15, %cst_14 {dimension_numbers = #tpu.dot_dimension_numbers<[1], [0], [0], [1], [0, 0, 1, 1], [], []>} : vector<8x128xf32>, vector<128x128xf32>, vector<8x128xf32> -> vector<8x128xf32>
    %c0_15 = arith.constant 0 : index
    %c0_16 = arith.constant 0 : index
    %17 = vector.load %arg7[%c0_15, %c0_16] : memref<1x128xf32, #tpu.memory_space<vmem>>, vector<1x128xf32>
    %18 = vector.broadcast %17 : vector<1x128xf32> to vector<8x128xf32>
    %19 = arith.addf %16, %18 : vector<8x128xf32>
    %cst_17 = arith.constant 0.000000e+00 : f32
    %20 = vector.broadcast %cst_17 : f32 to vector<8x128xf32>
    %21 = arith.maximumf %19, %20 : vector<8x128xf32>
    %c0_18 = arith.constant 0 : index
    %c0_19 = arith.constant 0 : index
    %22 = vector.load %arg8[%c0_18, %c0_19] : memref<128x128xf32, #tpu.memory_space<vmem>>, vector<128x128xf32>
    %cst_20 = arith.constant dense<0.000000e+00> : vector<8x128xf32>
    %23 = tpu.matmul %21, %22, %cst_20 {dimension_numbers = #tpu.dot_dimension_numbers<[1], [0], [0], [1], [0, 0, 1, 1], [], []>} : vector<8x128xf32>, vector<128x128xf32>, vector<8x128xf32> -> vector<8x128xf32>
    %c0_21 = arith.constant 0 : index
    %c0_22 = arith.constant 0 : index
    %24 = vector.load %arg9[%c0_21, %c0_22] : memref<1x128xf32, #tpu.memory_space<vmem>>, vector<1x128xf32>
    %25 = vector.broadcast %24 : vector<1x128xf32> to vector<8x128xf32>
    %26 = arith.addf %23, %25 : vector<8x128xf32>
    %c0_23 = arith.constant 0 : index
    %c0_24 = arith.constant 0 : index
    %27 = vector.load %arg10[%c0_23, %c0_24] : memref<8x128xf32, #tpu.memory_space<vmem>>, vector<8x128xf32>
    tpu.vector_store %arg10[%c0_23, %c0_24], %26 {strides = array<i32>} : memref<8x128xf32, #tpu.memory_space<vmem>>, vector<8x128xf32>,
    return
  }
  func.func @transform_0(%arg0: i32) -> (i32, i32) {
    %c0_i32 = arith.constant 0 : i32
    %c0_i32_0 = arith.constant 0 : i32
    return %arg0, %c0_i32 : i32, i32
  }
  func.func @transform_1(%arg0: i32) -> (i32, i32) {
    %c0_i32 = arith.constant 0 : i32
    %c0_i32_0 = arith.constant 0 : i32
    %c0_i32_1 = arith.constant 0 : i32
    return %c0_i32, %c0_i32_0 : i32, i32
  }
  func.func @transform_2(%arg0: i32) -> (i32, i32) {
    %c0_i32 = arith.constant 0 : i32
    %c0_i32_0 = arith.constant 0 : i32
    %c0_i32_1 = arith.constant 0 : i32
    return %c0_i32, %c0_i32_0 : i32, i32
  }
  func.func @transform_3(%arg0: i32) -> (i32, i32) {
    %c0_i32 = arith.constant 0 : i32
    %c0_i32_0 = arith.constant 0 : i32
    %c0_i32_1 = arith.constant 0 : i32
    return %c0_i32, %c0_i32_0 : i32, i32
  }
  func.func @transform_4(%arg0: i32) -> (i32, i32) {
    %c0_i32 = arith.constant 0 : i32
    %c0_i32_0 = arith.constant 0 : i32
    %c0_i32_1 = arith.constant 0 : i32
    return %c0_i32, %c0_i32_0 : i32, i32
  }
  func.func @transform_5(%arg0: i32) -> (i32, i32) {
    %c0_i32 = arith.constant 0 : i32
    %c0_i32_0 = arith.constant 0 : i32
    %c0_i32_1 = arith.constant 0 : i32
    return %c0_i32, %c0_i32_0 : i32, i32
  }
  func.func @transform_6(%arg0: i32) -> (i32, i32) {
    %c0_i32 = arith.constant 0 : i32
    %c0_i32_0 = arith.constant 0 : i32
    %c0_i32_1 = arith.constant 0 : i32
    return %c0_i32, %c0_i32_0 : i32, i32
  }
  func.func @transform_7(%arg0: i32) -> (i32, i32) {
    %c0_i32 = arith.constant 0 : i32
    %c0_i32_0 = arith.constant 0 : i32
    %c0_i32_1 = arith.constant 0 : i32
    return %c0_i32, %c0_i32_0 : i32, i32
  }
  func.func @transform_8(%arg0: i32) -> (i32, i32) {
    %c0_i32 = arith.constant 0 : i32
    %c0_i32_0 = arith.constant 0 : i32
    %c0_i32_1 = arith.constant 0 : i32
    return %c0_i32, %c0_i32_0 : i32, i32
  }
  func.func @transform_9(%arg0: i32) -> (i32, i32) {
    %c0_i32 = arith.constant 0 : i32
    %c0_i32_0 = arith.constant 0 : i32
    return %arg0, %c0_i32 : i32, i32
  }
}

</mosaic_0001>

<bundles_post_ra>
// kernel: tpu_custom_call.1
= control target key start
LH: loop header
LB: loop body
LE: loop exit
PB: predicated region body
PF: predicated region fallthrough
CT: control target
= control target key end

     0   :  { %s1806_s0 = inlined_call_operand.hbm [shape: f32[16,128], index: 0, kind: input, shape index: {}]   ;;  %s1807_s1 = inlined_call_operand.hbm [shape: f32[128,128], index: 1, kind: input, shape index: {}]   ;;  %s1808_s2 = inlined_call_operand.vmem [shape: f32[1,128], index: 2, kind: input, shape index: {}]   ;;  %s1809_s3 = inlined_call_operand.hbm [shape: f32[128,128], index: 3, kind: input, shape index: {}]   ;;  %s1810_s4 = inlined_call_operand.vmem [shape: f32[1,128], index: 4, kind: input, shape index: {}]   ;;  %s1811_s5 = inlined_call_operand.hbm [shape: f32[128,128], index: 5, kind: input, shape index: {}]   ;;  %s1812_s6 = inlined_call_operand.vmem [shape: f32[1,128], index: 6, kind: input, shape index: {}]   ;;  %s1813_s7 = inlined_call_operand.hbm [shape: f32[128,128], index: 7, kind: input, shape index: {}]   ;;  %s1814_s8 = inlined_call_operand.vmem [shape: f32[1,128], index: 8, kind: input, shape index: {}]   ;;  %s1815_s9 = inlined_call_operand.hbm [shape: f32[16,128], index: 9, kind: output, shape index: {}]  }
   0x1   :  { %1820 = sst [smem:[#allocation16_spill]] %s1807_s1 }
   0x2   :  { %1821 = sst [smem:[#allocation17_spill]] %s1809_s3 }
   0x3   :  { %1822 = sst [smem:[#allocation18_spill]] %s1811_s5 }
   0x4   :  { %1823 = sst [smem:[#allocation19_spill]] %s1813_s7 }
   0x5   :  { %14 = vsyncpa [#allocation3], 0 }
   0x6   :  { %16 = vsyncpa [#allocation3 + $0x1], 0 }
   0x7   :  { %17 = vsyncpa [#allocation6], 0 }
   0x8   :  { %18 = vsyncpa [#allocation9], 0 }
   0x9   :  { %19 = vsyncpa [#allocation4], 0 }
   0xa   :  { %21 = vsyncpa [#allocation4 + $0x1], 0  ;;  %s1494_s30 = smov 0   ;;  %s1496_s10 = smov 0  }
   0xb   :  { %s1498_s11 = smov 0   ;;  %s1500_s12 = smov 0  }
   0xc LB: > { %s1434_s13 = smov [#allocation5]   ;;  %s1515_s15 = sadd.s32 4294967295, %s1432_s12   ;;  %s1432_s12 = sphi %s1500_s12, %s1847_s12   ;;  %s1428_s11 = sphi %s1498_s11, %s1846_s11   ;;  %s1424_s10 = sphi %s1496_s10, %s1845_s10   ;;  %s1420_s30 = sphi %s1494_s30, %s1844_s30  }
   0xd   : > { %s264_s14 = sshll.u32 %s1434_s13, 4  ;;  %p906_p0 = scmp.ge.s32.totalorder %s1432_s12, 1  ;;  %s265_s14 = int_to_ptr.vmem [resolvable:$true] %s264_s14 }
   0xe   : > { %p1816_p1 = scmp.eq.s32.totalorder %s1515_s15, 0  ;;  %p252_p2 = scmp.lt.s32.totalorder %s1432_s12, 3 }
   0xf   : > { %s1435_s17 = smov [#allocation8]   ;;  %s1436_s20 = smov [#allocation7]  }
  0x10   : > { %p1520_p3 = pnand %p906_p0, %p252_p2  ;;  %s296_s18 = sshll.u32 %s1435_s17, 4  ;;  %s1533_s18 = int_to_ptr.vmem [resolvable:$true] %s296_s18 }
  0x11   : > { %s280_s21 = sshll.u32 %s1436_s20, 4  ;;  %s1239_s22 = scalar_lea.vmem %s265_s14, 2048  ;;  %s1535_s21 = int_to_ptr.vmem [resolvable:$true] %s280_s21 }
  0x12   : > { %s1824_s16 = scalar_select %p1520_p3, 1, 0 }
  0x13   : > { %p1157_p5 = pneg %p1520_p3  ;;  %p1240_p8 = scmp.ne.s32.totalorder %s265_s14, %s1239_s22 }
  0x14   : > { %p1247_p11 = scmp.lt.s32.totalorder %s265_s14, %s265_s14  ;;  %p1248_p12 = scmp.lt.s32.totalorder %s1239_s22, %s1239_s22 }
  0x15   : > { %p1529_p6 = pnand %p1157_p5, %p1816_p1 }
  0x16   : > { %p1249_p13 = por %p1248_p12, %p1247_p11 }
  0x17   : > { %p1230_p7 = pneg %p1529_p6 }
  0x19   : > { %p1242_p9 = pnand %p1240_p8, %p1230_p7 }
  0x1b   : > { %p1243_p10 = pneg %p1242_p9 }
  0x1d   : > { %p1250_p0 = pnand %p1249_p13, %p1243_p10 }
  0x1f   : > { %1253 = shalt.err (!%p1250_p0)
}
  0x20   : > { %s1437_s23 = smov 128   ;;  %s1438_s24 = smov 8  }
  0x21   : > { %s1826_s1 = sld [smem:[#allocation16_spill]]  ;;  %s1265_s27 = scalar_lea.vmem %s1533_s18, 2048 }
  0x22   : > { %p1266_p2 = scmp.ne.s32.totalorder %s1533_s18, %s1265_s27  ;;  %p1273_p9 = scmp.lt.s32.totalorder %s1533_s18, %s1533_s18 }
  0x23   : > { %p1274_p10 = scmp.lt.s32.totalorder %s1265_s27, %s1265_s27 }
  0x24   : > { %p1268_p5 = pnand %p1266_p2, %p1230_p7 }
  0x25   : > { %p1275_p11 = por %p1274_p10, %p1273_p9 }
  0x26   : > { %p1269_p8 = pneg %p1268_p5 }
  0x27   : > { %1160 = dma.hbm_to_vmem [thread:$0]  (!%p1529_p6), %s1826_s1, 2048, %s265_s14, [#allocation6], %s1437_s23, %s1437_s23, %s1438_s24  }
  0x28   : > { %p1276_p12 = pnand %p1275_p11, %p1269_p8 }
  0x2a   : > { %1279 = shalt.err (!%p1276_p12)
}
  0x2b   : > { %s1827_s5 = sld [smem:[#allocation18_spill]]  ;;  %s1291_s13 = scalar_lea.vmem %s1535_s21, 2048 }
  0x2c   : > { %p1292_p13 = scmp.ne.s32.totalorder %s1535_s21, %s1291_s13  ;;  %p1299_p5 = scmp.lt.s32.totalorder %s1535_s21, %s1535_s21 }
  0x2d   : > { %p1300_p8 = scmp.lt.s32.totalorder %s1291_s13, %s1291_s13 }
  0x2e   : > { %p1294_p0 = pnand %p1292_p13, %p1230_p7 }
  0x2f   : > { %p1301_p9 = por %p1300_p8, %p1299_p5 }
  0x30   : > { %p1295_p2 = pneg %p1294_p0 }
  0x31   : > { %1166 = dma.hbm_to_vmem [thread:$0]  (!%p1529_p6), %s1827_s5, 2048, %s1533_s18, [#allocation9], %s1437_s23, %s1437_s23, %s1438_s24  }
  0x32   : > { %p1302_p10 = pnand %p1301_p9, %p1295_p2 }
  0x34   : > { %1305 = shalt.err (!%p1302_p10)
}
  0x35   : > { %s1828_s3 = sld [smem:[#allocation17_spill]]  ;;  %s1439_s18 = smov [#allocation10]  }
  0x36   : > { %s312_s20 = sshll.u32 %s1439_s18, 4  ;;  %s313_s20 = int_to_ptr.vmem [resolvable:$true] %s312_s20 }
  0x37   : > { %s1317_s22 = scalar_lea.vmem %s313_s20, 2048  ;;  %p1325_p0 = scmp.lt.s32.totalorder %s313_s20, %s313_s20 }
  0x38   : > { %p1318_p11 = scmp.ne.s32.totalorder %s313_s20, %s1317_s22  ;;  %p1326_p2 = scmp.lt.s32.totalorder %s1317_s22, %s1317_s22 }
  0x3a   : > { %p1320_p12 = pnand %p1318_p11, %p1230_p7  ;;  %p1327_p5 = por %p1326_p2, %p1325_p0 }
  0x3b   : > { %1163 = dma.hbm_to_vmem [thread:$0]  (!%p1529_p6), %s1828_s3, 2048, %s1535_s21, [#allocation6], %s1437_s23, %s1437_s23, %s1438_s24  }
  0x3c   : > { %p1321_p13 = pneg %p1320_p12 }
  0x3e   : > { %p1328_p8 = pnand %p1327_p5, %p1321_p13 }
  0x40   : > { %1331 = shalt.err (!%p1328_p8)
}
  0x41   : > { %s1829_s7 = sld [smem:[#allocation19_spill]]  ;;  %s905_s19 = sadd.s32 4294967294, %s1432_s12  }
  0x42   : > { %s1595_s26 = sadd.s32 1, %s1432_s12   ;;  %s34_s28 = sadd.s32 1, %s1428_s11 }
  0x43   : > { %s31_s27 = ssub.s32 %s1432_s12, %s1595_s26  ;;  %p41_p9 = scmp.ne.s32.totalorder %s1428_s11, %s1424_s10 }
  0x44   : > { %p32_p7 = scmp.eq.s32.totalorder %s31_s27, 0  ;;  %p42_p10 = scmp.eq.s32.totalorder %s1432_s12, 0 }
  0x45   : > { %p47_p11 = scmp.ne.s32.totalorder %s1424_s10, %s1420_s30  ;;  %p239_p13 = scmp.eq.s32.totalorder %s1515_s15, 1 }
  0x46   : > { %s1606_s29 = scalar_select %p32_p7, %s1428_s11, %s34_s28  }
  0x47   : > { %1169 = dma.hbm_to_vmem [thread:$0]  (!%p1529_p6), %s1829_s7, 2048, %s313_s20, [#allocation9], %s1437_s23, %s1437_s23, %s1438_s24  }
  0x48   : > { %p1608_p12 = por %p42_p10, %p41_p9  ;;  %p1614_p6 = por %p1816_p1, %p47_p11 }
  0x49   : > { %p245_p0 = scmp.eq.s32.totalorder %s905_s19, 1  ;;  %p1182_p2 = scmp.lt.s32.totalorder %s1432_s12, 2 }
  0x4a   : > { %s1831_s23 = scalar_select %p1614_p6, 1, 0 }
  0x4b   : > { %s329_s24 = sand.u32 1, %s1428_s11   ;;  %p1621_p5 = por %p239_p13, %p41_p9 }
  0x4c   : > { %p1625_p8 = por %p245_p0, %p47_p11  ;;  %s912_s18 = sshll.u32 %s329_s24, 3 }
  0x4d   : > { %s1832_s14 = scalar_select %p1621_p5, 1, 0 }
  0x4e   : > { %s1833_s17 = scalar_select %p1625_p8, 1, 0 }
  0x4f   : > { %s913_s20 = sshll.u32 %s1432_s12, 7  ;;  %s333_s19 = scalar_lea.vmem [#allocation2], %s912_s18 }
  0x50   : > { %s1633_s25 = scalar_lea.hbm %s1806_s0, %s913_s20  ;;  %s340_s27 = sshll.u32 %s333_s19, 4  ;;  %s341_s27 = int_to_ptr.vmem [resolvable:$true] %s340_s27 }
  0x51   : > { %p1637_p7 = pnand %p1182_p2, %p1608_p12  ;;  %s330_s1 = scalar_lea.sflag [#allocation3], %s329_s24 }
  0x52   : > { %s1332_s3 = scalar_lea.hbm %s1633_s25, 128  ;;  %s1337_s21 = scalar_lea.hbm %s1806_s0, 256 }
  0x53   : > { %p1333_p9 = scmp.ne.s32.totalorder %s1633_s25, %s1332_s3  ;;  %p1334_p10 = pneg %p1637_p7 }
  0x54   : > { %p1338_p0 = scmp.lt.s32.totalorder %s1633_s25, %s1806_s0  ;;  %p1339_p12 = scmp.lt.s32.totalorder %s1337_s21, %s1332_s3 }
  0x55   : > { %p1335_p11 = pnand %p1334_p10, %p1333_p9 }
  0x56   : > { %p1340_p2 = por %p1339_p12, %p1338_p0 }
  0x57   : > { %p1336_p13 = pneg %p1335_p11 }
  0x59   : > { %p1341_p4 = pnand %p1340_p2, %p1336_p13 }
  0x5b   : > { %1344 = shalt.err (!%p1341_p4)
}
  0x5c   : > { %s1345_s13 = scalar_lea.vmem %s341_s27, 128  ;;  %s1440_s24 = smov [#allocation2]  }
  0x5d   : > { %p1346_p1 = scmp.ne.s32.totalorder %s341_s27, %s1345_s13  ;;  %s1350_s5 = sshll.u32 %s1440_s24, 4  ;;  %s1351_s5 = int_to_ptr.vmem [resolvable:$false] %s1350_s5 }
  0x5e   : > { %s1352_s7 = scalar_lea.vmem %s1351_s5, 256  ;;  %p1353_p9 = scmp.lt.s32.totalorder %s341_s27, %s1351_s5 }
  0x5f   : > { %p1348_p8 = pnand %p1346_p1, %p1334_p10  ;;  %p1354_p11 = scmp.lt.s32.totalorder %s1352_s7, %s1345_s13 }
  0x61   : > { %p1349_p5 = pneg %p1348_p8  ;;  %p1355_p6 = por %p1354_p11, %p1353_p9 }
  0x63   : > { %p1356_p3 = pnand %p1355_p6, %p1349_p5 }
  0x65   : > { %1359 = shalt.err (!%p1356_p3)
}
  0x66   : > { %1173 = dma.hbm_to_vmem [thread:$0]  (!%p1637_p7), %s1633_s25, 128, %s341_s27, %s330_s1  }
  0x67   : > { %p1835_p13 = scmp.ne.s32.totalorder %s1824_s16, 0 }
  0x68   : > { %s1658_s3 = sand.u32 (!%p1835_p13), 1, %s1424_s10   ;;  %p1836_p1 = scmp.ne.s32.totalorder (!%p1835_p13), %s1831_s23, 0 }
  0x69   : > { %349 = sbr.rel (%p1835_p13) target bundleno = 950 (0x3b6), region = 56  ;;  %s915_s20 = sshll.u32 (!%p1835_p13), %s1658_s3, 3 }
  0x6a   : > { %s352_s5 = scalar_lea.sflag (!%p1835_p13), [#allocation3], %s1658_s3  ;;  %s1664_s7 = scalar_lea.vmem (!%p1835_p13), [#allocation2], %s915_s20 }
  0x6e   : > { %1403 = dma.done.wait (%p1836_p1), %s352_s5, 128  }
  0x6f   : > { %1405 = vsyncadd (%p1836_p1), %s352_s5, 4294967168  ;;  %p1837_p3 = scmp.eq.s32.totalorder %s1515_s15, 0 }
  0x71   : > { %1407 = dma.done.wait (%p1837_p3), [#allocation6], 4096   ;;  %p1838_p4 = pmov %p1837_p3 }
  0x72   : > { %p1839_p6 = pmov %p1837_p3 }
  0x73   : > { %1409 = vsyncadd (%p1838_p4), [#allocation6], 4294963200 }
  0x74   : > { %1411 = dma.done.wait (%p1839_p6), [#allocation9], 4096   ;;  %p1840_p5 = pmov %p1837_p3 }
  0x75   : > { %v1441_v0 = vmov 0.0   ;;  %vm1442_vm0 = vmmov 0   ;;  %v422_v1 = vld [vmem:[#allocation5 + $0x78] sm:$0xff]  ;;  %v421_v2 = vld [vmem:[#allocation5 + $0x70] sm:$0xff]  ;;  %v420_v3 = vld [vmem:[#allocation5 + $0x68] sm:$0xff]  ;;  %s926_s18 = sshll.u32 %s1515_s15, 7 }
  0x76   : > { %1413 = vsyncadd (%p1840_p5), [#allocation9], 4294963200  ;;  %997 = vmatprep.subr.mxu0 %v1441_v0  ;;  %1029 = vmatprep.mubr.msk.f32.mxu0 %vm1442_vm0, %v1441_v0  ;;  %v419_v4 = vld [vmem:[#allocation5 + $0x60] sm:$0xff]  ;;  %v516_v5 = vld [vmem:[#allocation7 + $0x78] sm:$0xff]  ;;  %s405_s19 = scalar_lea.vmem [#allocation11], %s915_s20  ;;  %s784_s1 = scalar_lea.sflag [#allocation4], %s1658_s3 }
  0x77   : > { %1032 = vmatprep.subr.mxu1 %v1441_v0  ;;  %1064 = vmatprep.mubr.msk.f32.mxu1 %vm1442_vm0, %v1441_v0  ;;  %v418_v6 = vld [vmem:[#allocation5 + $0x58] sm:$0xff]  ;;  %v515_v7 = vld [vmem:[#allocation7 + $0x70] sm:$0xff]  ;;  %v514_v8 = vld [vmem:[#allocation7 + $0x68] sm:$0xff]  ;;  %s797_s13 = sshll.u32 %s405_s19, 4  ;;  %p1841_p7 = scmp.ne.s32.totalorder %s1832_s14, 0  ;;  %s798_s13 = int_to_ptr.vmem [resolvable:$true] %s797_s13 }
  0x78   : > { %998 = vmatpush3.msra.mxu0 %v422_v1  ;;  %1033 = vmatpush3.msra.mxu1 %v516_v5  ;;  %v417_v9 = vld [vmem:[#allocation5 + $0x50] sm:$0xff]  ;;  %v513_v10 = vld [vmem:[#allocation7 + $0x60] sm:$0xff]  ;;  %v416_v11 = vld [vmem:[#allocation5 + $0x48] sm:$0xff]  ;;  %s1360_s16 = scalar_lea.vmem %s798_s13, 128  ;;  %s1443_s15 = smov [#allocation11]  }
  0x79   : > { %999 = vmatprep.subr.mxu0 %v1441_v0  ;;  %1034 = vmatprep.subr.mxu1 %v1441_v0  ;;  %v512_v12 = vld [vmem:[#allocation7 + $0x58] sm:$0xff]  ;;  %v415_v13 = vld [vmem:[#allocation5 + $0x40] sm:$0xff]  ;;  %v511_v14 = vld [vmem:[#allocation7 + $0x50] sm:$0xff]  ;;  %p1361_p8 = scmp.ne.s32.totalorder %s798_s13, %s1360_s16  ;;  %s1364_s23 = sshll.u32 %s1443_s15, 4  ;;  %s1365_s23 = int_to_ptr.vmem [resolvable:$false] %s1364_s23 }
  0x7a   : > { %1000 = vmatpush3.msra.mxu0 %v421_v2  ;;  %1035 = vmatpush3.msra.mxu1 %v515_v7  ;;  %v414_v15 = vld [vmem:[#allocation5 + $0x38] sm:$0xff]  ;;  %v510_v16 = vld [vmem:[#allocation7 + $0x48] sm:$0xff]  ;;  %v413_v17 = vld [vmem:[#allocation5 + $0x30] sm:$0xff]  ;;  %s1366_s20 = scalar_lea.vmem %s1365_s23, 256  ;;  %p1367_p12 = scmp.lt.s32.totalorder %s798_s13, %s1365_s23 }
  0x7b   : > { %1001 = vmatprep.subr.mxu0 %v1441_v0  ;;  %1036 = vmatprep.subr.mxu1 %v1441_v0  ;;  %v509_v18 = vld [vmem:[#allocation7 + $0x40] sm:$0xff]  ;;  %v412_v19 = vld [vmem:[#allocation5 + $0x28] sm:$0xff]  ;;  %v508_v20 = vld [vmem:[#allocation7 + $0x38] sm:$0xff]  ;;  %p1362_p10 = pnand %p1361_p8, %p1841_p7  ;;  %p1368_p2 = scmp.lt.s32.totalorder %s1366_s20, %s1360_s16 }
  0x7c   : > { %1002 = vmatpush3.msra.mxu0 %v420_v3  ;;  %1037 = vmatpush3.msra.mxu1 %v514_v8  ;;  %v411_v21 = vld [vmem:[#allocation5 + $0x20] sm:$0xff]  ;;  %v507_v22 = vld [vmem:[#allocation7 + $0x30] sm:$0xff]  ;;  %v410_v23 = vld [vmem:[#allocation5 + $0x18] sm:$0xff] }
  0x7d   : > { %1003 = vmatprep.subr.mxu0 %v1441_v0  ;;  %1038 = vmatprep.subr.mxu1 %v1441_v0  ;;  %v506_v24 = vld [vmem:[#allocation7 + $0x28] sm:$0xff]  ;;  %v409_v25 = vld [vmem:[#allocation5 + $0x10] sm:$0xff]  ;;  %v505_v26 = vld [vmem:[#allocation7 + $0x20] sm:$0xff]  ;;  %p1363_p0 = pneg %p1362_p10  ;;  %p1369_p9 = por %p1368_p2, %p1367_p12 }
  0x7e   : > { %1004 = vmatpush3.msra.mxu0 %v419_v4  ;;  %1039 = vmatpush3.msra.mxu1 %v513_v10  ;;  %v408_v27 = vld [vmem:[#allocation5 + $0x8] sm:$0xff]  ;;  %v504_v28 = vld [vmem:[#allocation7 + $0x18] sm:$0xff]  ;;  %v407_v29 = vld [vmem:[#allocation5] sm:$0xff] }
  0x7f   : > { %1005 = vmatprep.subr.mxu0 %v1441_v0  ;;  %1040 = vmatprep.subr.mxu1 %v1441_v0  ;;  %v406_v30 = vld [vmem:[%s1664_s7] sm:$0xff]  ;;  %v502_v32 = vld [vmem:[#allocation7 + $0x8] sm:$0xff]  ;;  %v501_v33 = vld [vmem:[#allocation7] sm:$0xff]  ;;  %s1769_s7 = scalar_lea.hbm %s1815_s9, %s926_s18  ;;  %p1370_p11 = pnand %p1369_p9, %p1363_p0 }
  0x80   : > { %1006 = vmatpush3.msra.mxu0 %v418_v6  ;;  %1041 = vmatpush3.msra.mxu1 %v512_v12  ;;  %v503_v31 = vld [vmem:[#allocation7 + $0x10] sm:$0xff]  ;;  %v610_v34 = vld [vmem:[#allocation8 + $0x78] sm:$0xff]  ;;  %v608_v36 = vld [vmem:[#allocation8 + $0x68] sm:$0xff] }
  0x81   : > { %1007 = vmatprep.subr.mxu0 %v1441_v0  ;;  %1042 = vmatprep.subr.mxu1 %v1441_v0  ;;  %v609_v35 = vld [vmem:[#allocation8 + $0x70] sm:$0xff]  ;;  %v607_v37 = vld [vmem:[#allocation8 + $0x60] sm:$0xff]  ;;  %v606_v38 = vld [vmem:[#allocation8 + $0x58] sm:$0xff] }
  0x82   : > { %1008 = vmatpush3.msra.mxu0 %v417_v9  ;;  %1043 = vmatpush3.msra.mxu1 %v511_v14  ;;  %v605_v39 = vld [vmem:[#allocation8 + $0x50] sm:$0xff]  ;;  %v604_v40 = vld [vmem:[#allocation8 + $0x48] sm:$0xff]  ;;  %v603_v41 = vld [vmem:[#allocation8 + $0x40] sm:$0xff] }
  0x83   : > { %1009 = vmatprep.subr.mxu0 %v1441_v0  ;;  %1044 = vmatprep.subr.mxu1 %v1441_v0  ;;  %v602_v42 = vld [vmem:[#allocation8 + $0x38] sm:$0xff]  ;;  %v601_v43 = vld [vmem:[#allocation8 + $0x30] sm:$0xff]  ;;  %v600_v44 = vld [vmem:[#allocation8 + $0x28] sm:$0xff] }
  0x84   : > { %1010 = vmatpush3.msra.mxu0 %v416_v11  ;;  %1045 = vmatpush3.msra.mxu1 %v510_v16  ;;  %v599_v45 = vld [vmem:[#allocation8 + $0x20] sm:$0xff]  ;;  %v598_v46 = vld [vmem:[#allocation8 + $0x18] sm:$0xff]  ;;  %v921_v47 = vld [vmem:[%s1808_s2] ss:$0 sm:$0xff] }
  0x85   : > { %1011 = vmatprep.subr.mxu0 %v1441_v0  ;;  %1046 = vmatprep.subr.mxu1 %v1441_v0  ;;  %v597_v52 = vld [vmem:[#allocation8 + $0x10] sm:$0xff]  ;;  %v596_v53 = vld [vmem:[#allocation8 + $0x8] sm:$0xff]  ;;  %v595_v54 = vld [vmem:[#allocation8] sm:$0xff] }
  0x86   : > { %1012 = vmatpush3.msra.mxu0 %v415_v13  ;;  %1047 = vmatpush3.msra.mxu1 %v509_v18  ;;  %v704_v55 = vld [vmem:[#allocation10 + $0x78] sm:$0xff]  ;;  %v703_v56 = vld [vmem:[#allocation10 + $0x70] sm:$0xff]  ;;  %v702_v57 = vld [vmem:[#allocation10 + $0x68] sm:$0xff] }
  0x87   : > { %1013 = vmatprep.subr.mxu0 %v1441_v0  ;;  %1048 = vmatprep.subr.mxu1 %v1441_v0  ;;  %v701_v58 = vld [vmem:[#allocation10 + $0x60] sm:$0xff]  ;;  %v700_v59 = vld [vmem:[#allocation10 + $0x58] sm:$0xff]  ;;  %v699_v60 = vld [vmem:[#allocation10 + $0x50] sm:$0xff] }
  0x88   : > { %1014 = vmatpush3.msra.mxu0 %v414_v15  ;;  %1049 = vmatpush3.msra.mxu1 %v508_v20  ;;  %v698_v61 = vld [vmem:[#allocation10 + $0x48] sm:$0xff]  ;;  %v697_v62 = vld [vmem:[#allocation10 + $0x40] sm:$0xff]  ;;  %v696_v63 = vld [vmem:[#allocation10 + $0x38] sm:$0xff] }
  0x89   : > { %1015 = vmatprep.subr.mxu0 %v1441_v0  ;;  %1050 = vmatprep.subr.mxu1 %v1441_v0  ;;  %v695_v1 = vld [vmem:[#allocation10 + $0x30] sm:$0xff]  ;;  %v694_v2 = vld [vmem:[#allocation10 + $0x28] sm:$0xff]  ;;  %v693_v3 = vld [vmem:[#allocation10 + $0x20] sm:$0xff] }
  0x8a   : > { %1016 = vmatpush3.msra.mxu0 %v413_v17  ;;  %1051 = vmatpush3.msra.mxu1 %v507_v22  ;;  %v692_v4 = vld [vmem:[#allocation10 + $0x18] sm:$0xff]  ;;  %v922_v5 = vld [vmem:[%s1810_s4] ss:$0 sm:$0xff]  ;;  %v690_v11 = vld [vmem:[#allocation10 + $0x8] sm:$0xff] }
  0x8b   : > { %1017 = vmatprep.subr.mxu0 %v1441_v0  ;;  %1052 = vmatprep.subr.mxu1 %v1441_v0  ;;  %v691_v10 = vld [vmem:[#allocation10 + $0x10] sm:$0xff]  ;;  %v689_v12 = vld [vmem:[#allocation10] sm:$0xff] }
  0x8c   : > { %1018 = vmatpush3.msra.mxu0 %v412_v19  ;;  %1053 = vmatpush3.msra.mxu1 %v506_v24  ;;  %v923_v13 = vld [vmem:[%s1812_s6] ss:$0 sm:$0xff] }
  0x8d   : > { %1019 = vmatprep.subr.mxu0 %v1441_v0  ;;  %1054 = vmatprep.subr.mxu1 %v1441_v0  ;;  %v924_v18 = vld [vmem:[%s1814_s8] ss:$0 sm:$0xff] }
  0x8e   : > { %1020 = vmatpush3.msra.mxu0 %v411_v21  ;;  %1055 = vmatpush3.msra.mxu1 %v505_v26 }
  0x8f   : > { %1021 = vmatprep.subr.mxu0 %v1441_v0  ;;  %1056 = vmatprep.subr.mxu1 %v1441_v0 }
  0x90   : > { %1022 = vmatpush3.msra.mxu0 %v410_v23  ;;  %1057 = vmatpush3.msra.mxu1 %v504_v28 }
  0x91   : > { %1023 = vmatprep.subr.mxu0 %v1441_v0  ;;  %1058 = vmatprep.subr.mxu1 %v1441_v0 }
  0x92   : > { %1024 = vmatpush3.msra.mxu0 %v409_v25  ;;  %1059 = vmatpush3.msra.mxu1 %v503_v31 }
  0x93   : > { %1025 = vmatprep.subr.mxu0 %v1441_v0  ;;  %1060 = vmatprep.subr.mxu1 %v1441_v0 }
  0x94   : > { %1026 = vmatpush3.msra.mxu0 %v408_v27  ;;  %1061 = vmatpush3.msra.mxu1 %v502_v32 }
  0x95   : > { %1027 = vmatprep.subr.mxu0 %v1441_v0  ;;  %1062 = vmatprep.subr.mxu1 %v1441_v0 }
  0x96   : > { %1028 = vmatpush3.msra.mxu0 %v407_v29  ;;  %1063 = vmatpush3.msra.mxu1 %v501_v33 }
  0x97   : > { %1030 = vmatmul.mubr.f32.vlgmr.msra.gmra.mxu0 %v406_v30  ;;  %1067 = vmatprep.subr.mxu0 %v1441_v0 }
  0x98   : > { %1099 = vmatprep.mubr.msk.f32.mxu0 %vm1442_vm0, %v1441_v0  ;;  %1102 = vmatprep.subr.mxu1 %v1441_v0 }
  0x99   : > { %1068 = vmatpush3.msra.mxu0 %v610_v34 }
  0x9a   : > { %1069 = vmatprep.subr.mxu0 %v1441_v0 }
  0x9b   : > { %1070 = vmatpush3.msra.mxu0 %v609_v35 }
  0x9c   : > { %1071 = vmatprep.subr.mxu0 %v1441_v0 }
  0x9d   : > { %1072 = vmatpush3.msra.mxu0 %v608_v36 }
  0x9e   : > { %1073 = vmatprep.subr.mxu0 %v1441_v0 }
  0x9f   : > { %1074 = vmatpush3.msra.mxu0 %v607_v37 }
  0xa0   : > { %1075 = vmatprep.subr.mxu0 %v1441_v0 }
  0xa1   : > { %1076 = vmatpush3.msra.mxu0 %v606_v38 }
  0xa2   : > { %1077 = vmatprep.subr.mxu0 %v1441_v0 }
  0xa3   : > { %1078 = vmatpush3.msra.mxu0 %v605_v39 }
  0xa4   : > { %1079 = vmatprep.subr.mxu0 %v1441_v0 }
  0xa5   : > { %1080 = vmatpush3.msra.mxu0 %v604_v40 }
  0xa6   : > { %1081 = vmatprep.subr.mxu0 %v1441_v0 }
  0xa7   : > { %1082 = vmatpush3.msra.mxu0 %v603_v41 }
  0xa8   : > { %1083 = vmatprep.subr.mxu0 %v1441_v0 }
  0xa9   : > { %1084 = vmatpush3.msra.mxu0 %v602_v42 }
  0xaa   : > { %1085 = vmatprep.subr.mxu0 %v1441_v0 }
  0xab   : > { %1086 = vmatpush3.msra.mxu0 %v601_v43 }
  0xac   : > { %1087 = vmatprep.subr.mxu0 %v1441_v0 }
  0xad   : > { %1088 = vmatpush3.msra.mxu0 %v600_v44 }
  0xae   : > { %1089 = vmatprep.subr.mxu0 %v1441_v0 }
  0xaf   : > { %1090 = vmatpush3.msra.mxu0 %v599_v45 }
  0xb0   : > { %1091 = vmatprep.subr.mxu0 %v1441_v0 }
  0xb1   : > { %1092 = vmatpush3.msra.mxu0 %v598_v46 }
  0xb2   : > { %1093 = vmatprep.subr.mxu0 %v1441_v0 }
  0xb3   : > { %1094 = vmatpush3.msra.mxu0 %v597_v52 }
  0xb4   : > { %1095 = vmatprep.subr.mxu0 %v1441_v0 }
  0xb5   : > { %1096 = vmatpush3.msra.mxu0 %v596_v53 }
  0xb6   : > { %1097 = vmatprep.subr.mxu0 %v1441_v0 }
  0xb7   : > { %1098 = vmatpush3.msra.mxu0 %v595_v54 }
 0x157   : > { %v496_v48 = vpop.f32.mrf.mxu0 }
 0x158   : > { %v497_v49 = vadd.f32 %v921_v47, %v496_v48 }
 0x159   : > { %v1031_v50 = vpop.f32.mrf.mxu0 }
 0x15a   : > { %v500_v51 = vmax.f32 %v497_v49, 0.0 }
 0x15c   : > { %1065 = vmatmul.mubr.f32.vlgmr.msra.gmra.mxu1 %v500_v51 }
 0x15d   : > { %1134 = vmatprep.mubr.msk.f32.mxu1 %vm1442_vm0, %v1441_v0  ;;  %1103 = vmatpush3.msra.mxu1 %v704_v55 }
 0x15e   : > { %1104 = vmatprep.subr.mxu1 %v1441_v0 }
 0x15f   : > { %1105 = vmatpush3.msra.mxu1 %v703_v56 }
 0x160   : > { %1106 = vmatprep.subr.mxu1 %v1441_v0 }
 0x161   : > { %1107 = vmatpush3.msra.mxu1 %v702_v57 }
 0x162   : > { %1108 = vmatprep.subr.mxu1 %v1441_v0 }
 0x163   : > { %1109 = vmatpush3.msra.mxu1 %v701_v58 }
 0x164   : > { %1110 = vmatprep.subr.mxu1 %v1441_v0 }
 0x165   : > { %1111 = vmatpush3.msra.mxu1 %v700_v59 }
 0x166   : > { %1112 = vmatprep.subr.mxu1 %v1441_v0 }
 0x167   : > { %1113 = vmatpush3.msra.mxu1 %v699_v60 }
 0x168   : > { %1114 = vmatprep.subr.mxu1 %v1441_v0 }
 0x169   : > { %1115 = vmatpush3.msra.mxu1 %v698_v61 }
 0x16a   : > { %1116 = vmatprep.subr.mxu1 %v1441_v0 }
 0x16b   : > { %1117 = vmatpush3.msra.mxu1 %v697_v62 }
 0x16c   : > { %1118 = vmatprep.subr.mxu1 %v1441_v0 }
 0x16d   : > { %1119 = vmatpush3.msra.mxu1 %v696_v63 }
 0x16e   : > { %1120 = vmatprep.subr.mxu1 %v1441_v0 }
 0x16f   : > { %1121 = vmatpush3.msra.mxu1 %v695_v1 }
 0x170   : > { %1122 = vmatprep.subr.mxu1 %v1441_v0 }
 0x171   : > { %1123 = vmatpush3.msra.mxu1 %v694_v2 }
 0x172   : > { %1124 = vmatprep.subr.mxu1 %v1441_v0 }
 0x173   : > { %1125 = vmatpush3.msra.mxu1 %v693_v3 }
 0x174   : > { %1126 = vmatprep.subr.mxu1 %v1441_v0 }
 0x175   : > { %1127 = vmatpush3.msra.mxu1 %v692_v4 }
 0x176   : > { %1128 = vmatprep.subr.mxu1 %v1441_v0 }
 0x177   : > { %1129 = vmatpush3.msra.mxu1 %v691_v10 }
 0x178   : > { %1130 = vmatprep.subr.mxu1 %v1441_v0 }
 0x179   : > { %1131 = vmatpush3.msra.mxu1 %v690_v11 }
 0x17a   : > { %1132 = vmatprep.subr.mxu1 %v1441_v0 }
 0x17b   : > { %1133 = vmatpush3.msra.mxu1 %v689_v12 }
 0x21c   : > { %v590_v6 = vpop.f32.mrf.mxu1 }
 0x21d   : > { %v591_v7 = vadd.f32 %v922_v5, %v590_v6 }
 0x21e   : > { %v1066_v8 = vpop.f32.mrf.mxu1 }
 0x21f   : > { %v594_v9 = vmax.f32 %v591_v7, 0.0 }
 0x221   : > { %1100 = vmatmul.mubr.f32.vlgmr.msra.gmra.mxu0 %v594_v9 }
 0x2e1   : > { %v684_v14 = vpop.f32.mrf.mxu0 }
 0x2e2   : > { %v685_v15 = vadd.f32 %v923_v13, %v684_v14 }
 0x2e3   : > { %v1101_v16 = vpop.f32.mrf.mxu0 }
 0x2e4   : > { %v688_v17 = vmax.f32 %v685_v15, 0.0 }
 0x2e6   : > { %1135 = vmatmul.mubr.f32.vlgmr.msra.gmra.mxu1 %v688_v17 }
 0x3a6   : > { %v778_v0 = vpop.f32.mrf.mxu1 }
 0x3a7   : > { %v779_v19 = vadd.f32 %v924_v18, %v778_v0 }
 0x3a8   : > { %v1136_v20 = vpop.f32.mrf.mxu1 }
 0x3a9   : > { %782 = vst [vmem:[%s405_s19] sm:$0xff] %v779_v19 }
 0x3aa   : > { %1373 = shalt.err (!%p1370_p11)
}
 0x3ab   : > { %s1374_s25 = scalar_lea.hbm %s1769_s7, 128  ;;  %s1378_s28 = scalar_lea.hbm %s1815_s9, 256 }
 0x3ac   : > { %p1375_p13 = scmp.ne.s32.totalorder %s1769_s7, %s1374_s25  ;;  %p1379_p4 = scmp.lt.s32.totalorder %s1769_s7, %s1815_s9 }
 0x3ad   : > { %p1380_p6 = scmp.lt.s32.totalorder %s1378_s28, %s1374_s25 }
 0x3ae   : > { %p1376_p1 = pnand %p1375_p13, %p1841_p7 }
 0x3af   : > { %p1381_p5 = por %p1380_p6, %p1379_p4 }
 0x3b0   : > { %p1377_p3 = pneg %p1376_p1 }
 0x3b2   : > { %p1382_p8 = pnand %p1381_p5, %p1377_p3 }
 0x3b4   : > { %1385 = shalt.err (!%p1382_p8)
}
 0x3b5   : > { %1155 = dma.vmem_to_hbm [thread:$0]  (%p1841_p7), %s798_s13, 128, %s1769_s7, %s784_s1  }
 0x3b6 PF: > { %s809_s18 = sand.u32 1, %s1420_s30   ;;  %p1842_p10 = scmp.ne.s32.totalorder %s1833_s17, 0 }
 0x3b7   : > { %p1843_p0 = scmp.ge.s32.totalorder %s1432_s12, 2  ;;  %s810_s19 = scalar_lea.sflag [#allocation4], %s809_s18 }
 0x3b9   : > { %p1175_p12 = pnand %p1843_p0, %p1842_p10 }
 0x3bb   : > { %p1176_p2 = pneg %p1175_p12 }
 0x3bd   : > { %1415 = dma.done.wait (%p1176_p2), %s810_s19, 128  }
 0x3be   : > { %1417 = vsyncadd (%p1176_p2), %s810_s19, 4294967168  ;;  %p24_p9 = scmp.ge.s32.totalorder %s1595_s26, 4   ;;  %s1844_s30 = smov %s1424_s10 }
 0x3bf   : > { %s1845_s10 = smov %s1428_s11  ;;  %s1846_s11 = smov %s1606_s29 }
 0x3c0   : > { %s1847_s12 = smov %s1595_s26  ;;  %26 = sbr.rel (!%p24_p9) target bundleno = 12 (0xc), region = 117 }
 0x3c5   :  { %815 = vsyncpa [#allocation3], 1 }
 0x3c6   :  { %817 = vsyncpa [#allocation3 + $0x1], 1 }
 0x3c7   :  { %818 = vsyncpa [#allocation6], 1 }
 0x3c8   :  { %819 = vsyncpa [#allocation9], 1 }
 0x3c9   :  { %820 = vsyncpa [#allocation4], 1 }
 0x3ca   :  { %822 = vsyncpa [#allocation4 + $0x1], 1 }

</bundles_post_ra>
